<compile_context>
chip_gen: v5e
topology: v5e:2x2
jax: 0.10.0
libtpu: 0.0.40
codegen_flags: <defaults>
</compile_context>

<pallas_src>
import jax
import jax.numpy as jnp
from jax import lax
from jax.experimental import pallas as pl
from jax.experimental.pallas import tpu as pltpu


def _round_up(x: int, m: int) -> int:
    return ((x + m - 1) // m) * m


# ------------------------------------------------------------------
# Fused kernel factory: one grid step == TN samples.
#   img_ref:     (TN, C, HWP)  raw images (NCHW, spatial flattened+padded)
#   scale_ref:   (C, 1)        1 / pixel_std
#   shift_ref:   (C, 1)        -pixel_mean / pixel_std
#   cw_ref:      (C, HP)       1x1-conv weight, bf16, lane-padded
#   cb_ref:      (1, HP)       conv bias, f32, lane-padded
#   fw_ref:      (HP, NCP)     classifier weight, bf16, padded
#   fb_ref:      (1, NCP)      classifier bias, f32, padded
#   img_out_ref: (TN, C, HWP)  normalized images (f32)
#   feat_ref:    (1, TN, HP)   pooled features (padded lanes exactly 0)
#   logits_ref:  (1, TN, NCP)  logits (padded lanes exactly 0)
#   feat_sc:     (TN, HP)      VMEM scratch for per-sample features
# ------------------------------------------------------------------
def _make_fused_kernel(TN: int, HW: int, HWP: int):
    inv_hw = 1.0 / float(HW)

    def kernel(img_ref, scale_ref, shift_ref, cw_ref, cb_ref, fw_ref, fb_ref,
               img_out_ref, feat_ref, logits_ref, feat_sc):
        scale = scale_ref[...]          # (C, 1), hoisted out of the loop
        shift = shift_ref[...]

        def per_sample(n):
            # --- preprocess: per-channel FMA, no divide ---------------
            x = img_ref[n]                                  # (C, HWP) f32
            xn = x * scale + shift
            img_out_ref[n] = xn                             # f32 store

            # --- synthetic backbone: 1x1 conv over channel axis -------
            # transposed-LHS matmul (C,HWP)^T @ (C,HP); bf16 operands,
            # f32 MXU accumulation (avoids multi-pass f32 matmul).
            h = lax.dot_general(
                xn.astype(jnp.bfloat16), cw_ref[...],
                dimension_numbers=(((0,), (0,)), ((), ())),
                preferred_element_type=jnp.float32)         # (HWP, HP)
            h = jnp.maximum(h + cb_ref[...], 0.0)           # bias + ReLU
            if HWP != HW:
                # mask padded spatial rows out of the global-avg-pool
                rows = lax.broadcasted_iota(jnp.int32, h.shape, 0)
                h = jnp.where(rows < HW, h, 0.0)
            feat_sc[pl.ds(n, 1), :] = (
                jnp.sum(h, axis=0, keepdims=True) * inv_hw)  # (1, HP)

        if TN == 1:
            per_sample(0)
        else:
            def body(n, carry):
                per_sample(n)
                return carry
            lax.fori_loop(0, TN, body, 0)

        # --- classifier fused into the same kernel --------------------
        feats = feat_sc[...]                                 # (TN, HP) f32
        feat_ref[0] = feats
        logits_ref[0] = (
            jnp.dot(feats.astype(jnp.bfloat16), fw_ref[...],
                    preferred_element_type=jnp.float32)
            + fb_ref[...])

    return kernel


# ------------------------------------------------------------------
# ClassificationModelBase.forward equivalent (single pallas_call)
# ------------------------------------------------------------------
def classification_model_forward(images, labels, params):
    N, C, H, W = images.shape
    HW = H * W
    hidden = params["conv_w"].shape[1]
    num_classes = params["fc_w"].shape[1]
    HP = _round_up(hidden, 128)        # lane-dense hidden
    NCP = _round_up(num_classes, 128)  # lane-dense classes
    HWP = _round_up(HW, 128)           # lane-dense flattened spatial dim

    # ---- choose samples-per-grid-step (TN) from a VMEM budget ----------
    # double-buffered input + output image tiles ~= 4 * TN * C * HWP * 4 B.
    per_sample_bytes = C * HWP * 4
    img_tile_budget = 16 * 1024 * 1024          # safe on v5e / v6e / v7x
    tn = max(1, img_tile_budget // (4 * per_sample_bytes))
    if N >= 2:
        tn = min(tn, int(pl.cdiv(N, 2)))        # keep grid >= 2 (v7x megacore)
    tn = int(max(1, min(tn, N)))
    G = int(pl.cdiv(N, tn))
    NP = G * tn                                  # batch padded to grid

    img3d = images.astype(jnp.float32).reshape(N, C, HW)
    if NP != N or HWP != HW:
        img3d = jnp.zeros((NP, C, HWP), jnp.float32).at[:N, :, :HW].set(img3d)

    pixel_mean = params["pixel_mean"].astype(jnp.float32).reshape(C, 1)
    pixel_std = params["pixel_std"].astype(jnp.float32).reshape(C, 1)
    scale = 1.0 / pixel_std            # exact host-side reciprocal
    shift = -pixel_mean * scale

    conv_w = params["conv_w"].astype(jnp.float32)                  # (C, hidden)
    conv_b = params["conv_b"].astype(jnp.float32).reshape(1, hidden)
    fc_w = params["fc_w"].astype(jnp.float32)                      # (hidden, classes)
    fc_b = params["fc_b"].astype(jnp.float32).reshape(1, num_classes)

    # zero-pad lane dims to 128 (lane-dense matmuls / stores); matmul weights
    # are staged as bf16, biases stay f32 (added after f32 accumulation).
    conv_w_p = jnp.zeros((C, HP), jnp.bfloat16).at[:, :hidden].set(
        conv_w.astype(jnp.bfloat16))
    conv_b_p = jnp.zeros((1, HP), jnp.float32).at[:, :hidden].set(conv_b)
    fc_w_p = jnp.zeros((HP, NCP), jnp.bfloat16).at[:hidden, :num_classes].set(
        fc_w.astype(jnp.bfloat16))
    fc_b_p = jnp.zeros((1, NCP), jnp.float32).at[:, :num_classes].set(fc_b)

    kernel = _make_fused_kernel(tn, HW, HWP)

    img_out, feat_p, logits_p = pl.pallas_call(
        kernel,
        grid=(G,),
        out_shape=(
            jax.ShapeDtypeStruct((NP, C, HWP), jnp.float32),
            jax.ShapeDtypeStruct((G, tn, HP), jnp.float32),
            jax.ShapeDtypeStruct((G, tn, NCP), jnp.float32),
        ),
        in_specs=[
            pl.BlockSpec((tn, C, HWP), lambda i: (i, 0, 0)),
            pl.BlockSpec((C, 1), lambda i: (0, 0)),
            pl.BlockSpec((C, 1), lambda i: (0, 0)),
            pl.BlockSpec((C, HP), lambda i: (0, 0)),
            pl.BlockSpec((1, HP), lambda i: (0, 0)),
            pl.BlockSpec((HP, NCP), lambda i: (0, 0)),
            pl.BlockSpec((1, NCP), lambda i: (0, 0)),
        ],
        out_specs=(
            pl.BlockSpec((tn, C, HWP), lambda i: (i, 0, 0)),
            pl.BlockSpec((1, tn, HP), lambda i: (i, 0, 0)),
            pl.BlockSpec((1, tn, NCP), lambda i: (i, 0, 0)),
        ),
        scratch_shapes=[pltpu.VMEM((tn, HP), jnp.float32)],
        input_output_aliases={0: 0},     # normalized image overwrites staging
        compiler_params=pltpu.CompilerParams(
            dimension_semantics=("parallel",),
            vmem_limit_bytes=32 * 1024 * 1024),
    )(img3d, scale, shift, conv_w_p, conv_b_p, fc_w_p, fc_b_p)

    outputs = {}
    outputs["images"] = img_out[:N, :, :HW].reshape(N, C, H, W)
    outputs["labels"] = labels
    outputs["features"] = feat_p.reshape(NP, HP)[:N, :hidden]
    outputs["logits"] = logits_p.reshape(NP, NCP)[:N, :num_classes]
    return outputs


def _reference_forward(images, params):
    """Pure-JAX reference mirroring the PyTorch semantics (f32 throughout)."""
    N, C, H, W = images.shape
    ref_images = (images - params["pixel_mean"].reshape(1, C, 1, 1)) / \
        params["pixel_std"].reshape(1, C, 1, 1)
    x = jnp.transpose(ref_images, (0, 2, 3, 1)).reshape(N, H * W, C)
    ref_feat = jnp.mean(
        jnp.maximum(
            jnp.einsum("nsc,ch->nsh", x, params["conv_w"]) + params["conv_b"],
            0.0),
        axis=1)
    ref_logits = ref_feat @ params["fc_w"] + params["fc_b"]
    return ref_images, ref_feat, ref_logits


if __name__ == "__main__":
    # Small shapes: batch=2, channels=4, spatial=16x16, hidden=32, classes=10.
    C, H, W = 4, 16, 16
    HIDDEN, NUM_CLASSES = 32, 10

    key = jax.random.PRNGKey(0)
    k_img, k_cw, k_cb, k_fw, k_fb, k_img2 = jax.random.split(key, 6)

    params = {
        # registered buffers (pixel_mean / pixel_std), per-channel
        "pixel_mean": jnp.array([0.485, 0.456, 0.406, 0.5], dtype=jnp.float32),
        "pixel_std": jnp.array([0.229, 0.224, 0.225, 0.25], dtype=jnp.float32),
        # synthetic backbone params: 1x1 conv C -> HIDDEN
        "conv_w": jax.random.normal(k_cw, (C, HIDDEN), dtype=jnp.float32) * 0.1,
        "conv_b": jax.random.normal(k_cb, (1, HIDDEN), dtype=jnp.float32) * 0.01,
        # synthetic classifier params: dense HIDDEN -> NUM_CLASSES
        "fc_w": jax.random.normal(k_fw, (HIDDEN, NUM_CLASSES), dtype=jnp.float32) * 0.1,
        "fc_b": jax.random.normal(k_fb, (1, NUM_CLASSES), dtype=jnp.float32) * 0.01,
    }

    forward = jax.jit(classification_model_forward)

    # ---- primary run: batch = 2 (TN = 1 per step, grid = 2) ----------------
    N = 2
    images = jax.random.uniform(k_img, (N, C, H, W), dtype=jnp.float32)
    labels = jnp.arange(N, dtype=jnp.int32)
    outputs = forward(images, labels, params)
    jax.block_until_ready(outputs)

    ref_images, ref_feat, ref_logits = _reference_forward(images, params)
    assert jnp.allclose(outputs["images"], ref_images, atol=1e-5)
    # bf16 MXU operands with f32 accumulation -> relaxed tolerance.
    assert jnp.allclose(outputs["features"], ref_feat, atol=1e-2, rtol=1e-2)
    assert jnp.allclose(outputs["logits"], ref_logits, atol=1e-2, rtol=1e-2)
    assert jnp.array_equal(outputs["labels"], labels)

    # ---- second run: batch = 16 exercises the batched (TN > 1) path --------
    N2 = 16
    images2 = jax.random.uniform(k_img2, (N2, C, H, W), dtype=jnp.float32)
    labels2 = jnp.arange(N2, dtype=jnp.int32)
    outputs2 = forward(images2, labels2, params)
    jax.block_until_ready(outputs2)

    ref_images2, ref_feat2, ref_logits2 = _reference_forward(images2, params)
    assert jnp.allclose(outputs2["images"], ref_images2, atol=1e-5)
    assert jnp.allclose(outputs2["features"], ref_feat2, atol=1e-2, rtol=1e-2)
    assert jnp.allclose(outputs2["logits"], ref_logits2, atol=1e-2, rtol=1e-2)
    assert jnp.array_equal(outputs2["labels"], labels2)

    print("KERNEL_OK")
</pallas_src>

<mosaic_0001>
module attributes {stable_mosaic.version = 11 : i64} {
  func.func @kernel(%arg0: i32, %arg1: memref<1x4x256xf32, #tpu.memory_space<vmem>>, %arg2: memref<4x1xf32, #tpu.memory_space<vmem>>, %arg3: memref<4x1xf32, #tpu.memory_space<vmem>>, %arg4: memref<4x128xbf16, #tpu.memory_space<vmem>>, %arg5: memref<1x128xf32, #tpu.memory_space<vmem>>, %arg6: memref<128x128xbf16, #tpu.memory_space<vmem>>, %arg7: memref<1x128xf32, #tpu.memory_space<vmem>>, %arg8: memref<1x4x256xf32, #tpu.memory_space<vmem>>, %arg9: memref<1x1x128xf32, #tpu.memory_space<vmem>>, %arg10: memref<1x1x128xf32, #tpu.memory_space<vmem>>, %arg11: memref<1x128xf32, #tpu.memory_space<vmem>>) attributes {dimension_semantics = [#tpu.dimension_semantics<parallel>], iteration_bounds = array<i64: 2>, scalar_prefetch = 0 : i64, scratch_operands = 1 : i64, tpu.core_type = #tpu.core_type<tc>, window_params = [{transform_indices = @transform_0, window_bounds = array<i64: 1, 4, 256>}, {pipeline_mode = #tpu.pipeline_mode<synchronous>, transform_indices = @transform_1, window_bounds = array<i64: 4, 1>}, {pipeline_mode = #tpu.pipeline_mode<synchronous>, transform_indices = @transform_2, window_bounds = array<i64: 4, 1>}, {pipeline_mode = #tpu.pipeline_mode<synchronous>, transform_indices = @transform_3, window_bounds = array<i64: 4, 128>}, {pipeline_mode = #tpu.pipeline_mode<synchronous>, transform_indices = @transform_4, window_bounds = array<i64: 1, 128>}, {pipeline_mode = #tpu.pipeline_mode<synchronous>, transform_indices = @transform_5, window_bounds = array<i64: 128, 128>}, {pipeline_mode = #tpu.pipeline_mode<synchronous>, transform_indices = @transform_6, window_bounds = array<i64: 1, 128>}, {transform_indices = @transform_7, window_bounds = array<i64: 1, 4, 256>}, {transform_indices = @transform_8, window_bounds = array<i64: 1, 1, 128>}, {transform_indices = @transform_9, window_bounds = array<i64: 1, 1, 128>}]} {
    %c0 = arith.constant 0 : index
    %c0_0 = arith.constant 0 : index
    %0 = vector.load %arg2[%c0, %c0_0] : memref<4x1xf32, #tpu.memory_space<vmem>>, vector<4x1xf32>
    %c0_1 = arith.constant 0 : index
    %c0_2 = arith.constant 0 : index
    %1 = vector.load %arg3[%c0_1, %c0_2] : memref<4x1xf32, #tpu.memory_space<vmem>>, vector<4x1xf32>
    %c0_3 = arith.constant 0 : index
    %c0_4 = arith.constant 0 : index
    %c0_5 = arith.constant 0 : index
    %2 = vector.load %arg1[%c0_3, %c0_4, %c0_5] : memref<1x4x256xf32, #tpu.memory_space<vmem>>, vector<1x4x256xf32>
    %3 = vector.shape_cast %2 : vector<1x4x256xf32> to vector<4x256xf32>
    %4 = vector.broadcast %0 : vector<4x1xf32> to vector<4x256xf32>
    %5 = arith.mulf %3, %4 : vector<4x256xf32>
    %6 = vector.broadcast %1 : vector<4x1xf32> to vector<4x256xf32>
    %7 = arith.addf %5, %6 : vector<4x256xf32>
    %c0_6 = arith.constant 0 : index
    %c0_7 = arith.constant 0 : index
    %c0_8 = arith.constant 0 : index
    %8 = vector.load %arg8[%c0_6, %c0_7, %c0_8] : memref<1x4x256xf32, #tpu.memory_space<vmem>>, vector<1x4x256xf32>
    %9 = vector.shape_cast %8 : vector<1x4x256xf32> to vector<4x256xf32>
    %10 = vector.shape_cast %7 : vector<4x256xf32> to vector<1x4x256xf32>
    tpu.vector_store %arg8[%c0_6, %c0_7, %c0_8], %10 {strides = array<i32>} : memref<1x4x256xf32, #tpu.memory_space<vmem>>, vector<1x4x256xf32>,
    %11 = arith.truncf %7 : vector<4x256xf32> to vector<4x256xbf16>
    %c0_9 = arith.constant 0 : index
    %c0_10 = arith.constant 0 : index
    %12 = vector.load %arg4[%c0_9, %c0_10] : memref<4x128xbf16, #tpu.memory_space<vmem>>, vector<4x128xbf16>
    %cst = arith.constant dense<0.000000e+00> : vector<256x128xf32>
    %13 = tpu.matmul %11, %12, %cst {dimension_numbers = #tpu.dot_dimension_numbers<[0], [0], [1], [1], [0, 1, 1, 1], [], []>} : vector<4x256xbf16>, vector<4x128xbf16>, vector<256x128xf32> -> vector<256x128xf32>
    %c0_11 = arith.constant 0 : index
    %c0_12 = arith.constant 0 : index
    %14 = vector.load %arg5[%c0_11, %c0_12] : memref<1x128xf32, #tpu.memory_space<vmem>>, vector<1x128xf32>
    %15 = vector.broadcast %14 : vector<1x128xf32> to vector<256x128xf32>
    %16 = arith.addf %13, %15 : vector<256x128xf32>
    %cst_13 = arith.constant 0.000000e+00 : f32
    %17 = vector.broadcast %cst_13 : f32 to vector<256x128xf32>
    %18 = arith.maximumf %16, %17 : vector<256x128xf32>
    %cst_14 = arith.constant dense<0.000000e+00> : vector<128xf32>
    %19 = vector.multi_reduction <add>, %18, %cst_14 [0] : vector<256x128xf32> to vector<128xf32>
    %20 = vector.shape_cast %19 : vector<128xf32> to vector<1x128xf32>
    %cst_15 = arith.constant 3.906250e-03 : f32
    %21 = vector.broadcast %cst_15 : f32 to vector<1x128xf32>
    %22 = arith.mulf %20, %21 : vector<1x128xf32>
    %c0_16 = arith.constant 0 : index
    %c0_17 = arith.constant 0 : index
    %23 = vector.load %arg11[%c0_16, %c0_17] : memref<1x128xf32, #tpu.memory_space<vmem>>, vector<1x128xf32>
    tpu.vector_store %arg11[%c0_16, %c0_17], %22 {strides = array<i32>} : memref<1x128xf32, #tpu.memory_space<vmem>>, vector<1x128xf32>,
    %c0_18 = arith.constant 0 : index
    %c0_19 = arith.constant 0 : index
    %24 = vector.load %arg11[%c0_18, %c0_19] : memref<1x128xf32, #tpu.memory_space<vmem>>, vector<1x128xf32>
    %c0_20 = arith.constant 0 : index
    %c0_21 = arith.constant 0 : index
    %c0_22 = arith.constant 0 : index
    %25 = vector.load %arg9[%c0_20, %c0_21, %c0_22] : memref<1x1x128xf32, #tpu.memory_space<vmem>>, vector<1x1x128xf32>
    %26 = vector.shape_cast %25 : vector<1x1x128xf32> to vector<1x128xf32>
    %27 = vector.shape_cast %24 : vector<1x128xf32> to vector<1x1x128xf32>
    tpu.vector_store %arg9[%c0_20, %c0_21, %c0_22], %27 {strides = array<i32>} : memref<1x1x128xf32, #tpu.memory_space<vmem>>, vector<1x1x128xf32>,
    %28 = arith.truncf %24 : vector<1x128xf32> to vector<1x128xbf16>
    %c0_23 = arith.constant 0 : index
    %c0_24 = arith.constant 0 : index
    %29 = vector.load %arg6[%c0_23, %c0_24] : memref<128x128xbf16, #tpu.memory_space<vmem>>, vector<128x128xbf16>
    %cst_25 = arith.constant dense<0.000000e+00> : vector<1x128xf32>
    %30 = tpu.matmul %28, %29, %cst_25 {dimension_numbers = #tpu.dot_dimension_numbers<[1], [0], [0], [1], [0, 0, 1, 1], [], []>} : vector<1x128xbf16>, vector<128x128xbf16>, vector<1x128xf32> -> vector<1x128xf32>
    %c0_26 = arith.constant 0 : index
    %c0_27 = arith.constant 0 : index
    %31 = vector.load %arg7[%c0_26, %c0_27] : memref<1x128xf32, #tpu.memory_space<vmem>>, vector<1x128xf32>
    %32 = arith.addf %30, %31 : vector<1x128xf32>
    %c0_28 = arith.constant 0 : index
    %c0_29 = arith.constant 0 : index
    %c0_30 = arith.constant 0 : index
    %33 = vector.load %arg10[%c0_28, %c0_29, %c0_30] : memref<1x1x128xf32, #tpu.memory_space<vmem>>, vector<1x1x128xf32>
    %34 = vector.shape_cast %33 : vector<1x1x128xf32> to vector<1x128xf32>
    %35 = vector.shape_cast %32 : vector<1x128xf32> to vector<1x1x128xf32>
    tpu.vector_store %arg10[%c0_28, %c0_29, %c0_30], %35 {strides = array<i32>} : memref<1x1x128xf32, #tpu.memory_space<vmem>>, vector<1x1x128xf32>,
    return
  }
  func.func @transform_0(%arg0: i32) -> (i32, i32, i32) {
    %c0_i32 = arith.constant 0 : i32
    %c0_i32_0 = arith.constant 0 : i32
    %c0_i32_1 = arith.constant 0 : i32
    return %arg0, %c0_i32, %c0_i32_0 : i32, i32, i32
  }
  func.func @transform_1(%arg0: i32) -> (i32, i32) {
    %c0_i32 = arith.constant 0 : i32
    %c0_i32_0 = arith.constant 0 : i32
    %c0_i32_1 = arith.constant 0 : i32
    return %c0_i32, %c0_i32_0 : i32, i32
  }
  func.func @transform_2(%arg0: i32) -> (i32, i32) {
    %c0_i32 = arith.constant 0 : i32
    %c0_i32_0 = arith.constant 0 : i32
    %c0_i32_1 = arith.constant 0 : i32
    return %c0_i32, %c0_i32_0 : i32, i32
  }
  func.func @transform_3(%arg0: i32) -> (i32, i32) {
    %c0_i32 = arith.constant 0 : i32
    %c0_i32_0 = arith.constant 0 : i32
    %c0_i32_1 = arith.constant 0 : i32
    return %c0_i32, %c0_i32_0 : i32, i32
  }
  func.func @transform_4(%arg0: i32) -> (i32, i32) {
    %c0_i32 = arith.constant 0 : i32
    %c0_i32_0 = arith.constant 0 : i32
    %c0_i32_1 = arith.constant 0 : i32
    return %c0_i32, %c0_i32_0 : i32, i32
  }
  func.func @transform_5(%arg0: i32) -> (i32, i32) {
    %c0_i32 = arith.constant 0 : i32
    %c0_i32_0 = arith.constant 0 : i32
    %c0_i32_1 = arith.constant 0 : i32
    return %c0_i32, %c0_i32_0 : i32, i32
  }
  func.func @transform_6(%arg0: i32) -> (i32, i32) {
    %c0_i32 = arith.constant 0 : i32
    %c0_i32_0 = arith.constant 0 : i32
    %c0_i32_1 = arith.constant 0 : i32
    return %c0_i32, %c0_i32_0 : i32, i32
  }
  func.func @transform_7(%arg0: i32) -> (i32, i32, i32) {
    %c0_i32 = arith.constant 0 : i32
    %c0_i32_0 = arith.constant 0 : i32
    %c0_i32_1 = arith.constant 0 : i32
    return %arg0, %c0_i32, %c0_i32_0 : i32, i32, i32
  }
  func.func @transform_8(%arg0: i32) -> (i32, i32, i32) {
    %c0_i32 = arith.constant 0 : i32
    %c0_i32_0 = arith.constant 0 : i32
    %c0_i32_1 = arith.constant 0 : i32
    return %arg0, %c0_i32, %c0_i32_0 : i32, i32, i32
  }
  func.func @transform_9(%arg0: i32) -> (i32, i32, i32) {
    %c0_i32 = arith.constant 0 : i32
    %c0_i32_0 = arith.constant 0 : i32
    %c0_i32_1 = arith.constant 0 : i32
    return %arg0, %c0_i32, %c0_i32_0 : i32, i32, i32
  }
}

</mosaic_0001>

<bundles_post_ra>
// kernel: mul.1
= control target key start
LH: loop header
LB: loop body
LE: loop exit
PB: predicated region body
PF: predicated region fallthrough
CT: control target
= control target key end

     0   :  { %s34_s0 = inlined_call_operand.vmem [shape: f32[4,1], index: 0, kind: input, shape index: {}]   ;;  %s35_s1 = inlined_call_operand.vmem [shape: f32[4,1], index: 1, kind: input, shape index: {}]   ;;  %s36_s2 = inlined_call_operand.vmem [shape: f32[4,1], index: 2, kind: output, shape index: {}]  }
   0x1   :  { %v3_v0 = vld [vmem:[%s34_s0] sm:$0xf] }
   0x2   :  { %v4_v1 = vld [vmem:[%s35_s1] sm:$0xf] }
   0x3   :  { %v7_v2 = vmul.f32 %v4_v1, %v3_v0 }
   0x5   :  { %9 = vst [vmem:[%s36_s2] sm:$0xf] %v7_v2 }

// kernel: classification_model_forward.1
= control target key start
LH: loop header
LB: loop body
LE: loop exit
PB: predicated region body
PF: predicated region fallthrough
CT: control target
= control target key end

     0   :  { %s1342_s0 = inlined_call_operand.vmem [shape: f32[2,4,256], index: 0, kind: input, shape index: {}, may-alias: {0,7}]   ;;  %s1343_s1 = inlined_call_operand.vmem [shape: f32[4,1], index: 1, kind: input, shape index: {}]   ;;  %s1344_s2 = inlined_call_operand.vmem [shape: f32[4,1], index: 2, kind: input, shape index: {}]   ;;  %s1345_s3 = inlined_call_operand.vmem [shape: bf16[4,128], index: 3, kind: input, shape index: {}]   ;;  %s1346_s4 = inlined_call_operand.vmem [shape: f32[1,128], index: 4, kind: input, shape index: {}]   ;;  %s1347_s5 = inlined_call_operand.vmem [shape: bf16[128,128], index: 5, kind: input, shape index: {}]   ;;  %s1348_s6 = inlined_call_operand.vmem [shape: f32[1,128], index: 6, kind: input, shape index: {}]   ;;  %s1349_s7 = inlined_call_operand.vmem [shape: f32[2,4,256], index: 7, kind: output, shape index: {0}, may-alias: {0,7}]   ;;  %s1350_s8 = inlined_call_operand.hbm [shape: f32[2,1,128], index: 8, kind: output, shape index: {1}]   ;;  %s1351_s9 = inlined_call_operand.hbm [shape: f32[2,1,128], index: 9, kind: output, shape index: {2}]  }
   0x1   :  { %1352 = sst [smem:[#allocation9_spill]] %s1342_s0 }
   0x2   :  { %1353 = sst [smem:[#allocation10_spill]] %s1343_s1 }
   0x3   :  { %1354 = sst [smem:[#allocation11_spill]] %s1344_s2 }
   0x4   :  { %15 = vsyncpa [#allocation4], 0 }
   0x5   :  { %17 = vsyncpa [#allocation4 + $0x1], 0 }
   0x6   :  { %18 = vsyncpa [#allocation6], 0 }
   0x7   :  { %20 = vsyncpa [#allocation6 + $0x1], 0  ;;  %s1121_s30 = smov 0   ;;  %s1123_s10 = smov 0  }
   0x8   :  { %s1125_s11 = smov 0   ;;  %s1127_s12 = smov 0  }
   0x9 LB: > { %s1142_s13 = sadd.s32 4294967295, %s1067_s12   ;;  %s855_s14 = sadd.s32 4294967294, %s1067_s12   ;;  %s1067_s12 = sphi %s1127_s12, %s1363_s12   ;;  %s1063_s11 = sphi %s1125_s11, %s1362_s11   ;;  %s1059_s10 = sphi %s1123_s10, %s1361_s10   ;;  %s1055_s30 = sphi %s1121_s30, %s1360_s30  }
   0xa   : > { %s1146_s15 = sadd.s32 1, %s1067_s12   ;;  %s211_s16 = sadd.s32 1, %s1063_s11 }
   0xb   : > { %s208_s17 = ssub.s32 %s1067_s12, %s1146_s15  ;;  %p221_p0 = scmp.ne.s32.totalorder %s1063_s11, %s1059_s10 }
   0xc   : > { %p209_p1 = scmp.eq.s32.totalorder %s208_s17, 0  ;;  %p222_p2 = scmp.eq.s32.totalorder %s1142_s13, 1 }
   0xd   : > { %p227_p3 = scmp.ne.s32.totalorder %s1059_s10, %s1055_s30  ;;  %p228_p4 = scmp.eq.s32.totalorder %s855_s14, 1 }
   0xe   : > { %s1157_s18 = scalar_select %p209_p1, %s1063_s11, %s211_s16  }
   0xf   : > { %p1159_p5 = por %p222_p2, %p221_p0  ;;  %p1163_p6 = por %p228_p4, %p227_p3 }
  0x10   : > { %p858_p7 = scmp.ge.s32.totalorder %s1067_s12, 1  ;;  %p298_p8 = scmp.lt.s32.totalorder %s1067_s12, 3 }
  0x12   : > { %p299_p9 = pnand %p858_p7, %p298_p8 }
  0x13   : > { %s1357_s1 = sld [smem:[#allocation10_spill]] (!%p299_p9)  ;;  %p342_p10 = scmp.lt.s32.totalorder (!%p299_p9), %s1142_s13, 1 }
  0x14   : > { %302 = sbr.rel (%p299_p9) target bundleno = 810 (0x32a), region = 48  ;;  %s1358_s2 = sld [smem:[#allocation11_spill]] (!%p299_p9) }
  0x15   : > { %s1359_s0 = sld [smem:[#allocation9_spill]] (!%p299_p9)  ;;  %s1288_s29 = sand.u32 (!%p299_p9), 1, %s1059_s10  }
  0x16   : > { %s335_s14 = scalar_lea.vmem (!%p299_p9), [#allocation3], %s1288_s29  ;;  %s730_s21 = scalar_lea.hbm (!%p299_p9), %s1350_s8, %s1142_s13 }
  0x17   : > { %s734_s23 = sshll.u32 (!%p299_p9), %s730_s21, 4  ;;  %s715_s24 = scalar_lea.sflag (!%p299_p9), [#allocation4], %s1288_s29  ;;  %s735_s23 = int_to_ptr.hbm [resolvable:$true] %s734_s23 }
  0x18   : > { %s987_s25 = sshra.s32 (!%p299_p9), %s735_s23, 4  ;;  %s988_s25 = int_to_ptr.hbm [resolvable:$true] %s987_s25 }
  0x19   : > { %v353_v0 = vld [vmem:[%s1357_s1] sm:$0xf]  ;;  %v1069_v1 = vmov 0   ;;  %vm463_vm0 = vcmask 1041408   ;;  %s343_s27 = scalar_select %p342_p10, %s1142_s13, 1  ;;  %vm414_vm1 = vcmask 31744  }
  0x1a   : > { %971 = vset.pattern.permute.xlu0 %v1069_v1  ;;  %v354_v2 = vld [vmem:[%s1358_s2] sm:$0xf]  ;;  %v1070_v5 = vmov 839922192   ;;  %s989_s26 = scalar_lea.hbm %s988_s25, 1  ;;  %p994_p0 = scmp.lt.s32.totalorder %s988_s25, %s1350_s8 }
  0x1b   : > { %358 = vperm.xlu0 %971, %v353_v0   ;;  %v385_v3 = vld [vmem:[%s1345_s3] sm:$0x3]  ;;  %v361_v6 = vunpack.c.l.s4 %v1070_v5  ;;  %s913_s28 = sshll.u32 %s343_s27, 3  ;;  %p990_p11 = scmp.ne.s32.totalorder %s988_s25, %s989_s26 }
  0x1c   : > { %v465_v4 = vsel %vm463_vm0, %v385_v3, 0  ;;  %s346_s16 = scalar_lea.vmem %s1359_s0, %s913_s28  ;;  %s351_s22 = scalar_lea.vmem %s1349_s7, %s913_s28  ;;  %v1215_v52 = vld [vmem:[%s1346_s4] ss:$0 sm:$0xff] }
  0x1d   : > { %474 = vmatpush.bf16.msra.mxu0 %v465_v4  ;;  %924 = vmatpush.bf16.msra.mxu3 %v465_v4  ;;  %v362_v8 = vunpack.c.0.s8 %v361_v6  ;;  %v355_v10 = vld [vmem:[%s346_s16] sm:$0xff]  ;;  %p991_p12 = pnand %p990_p11, %p1159_p5  ;;  %s993_s0 = scalar_lea.hbm %s1350_s8, 2 }
  0x1e   : > { %923 = vmatpush.bf16.msra.mxu2 %v465_v4  ;;  %p995_p1 = scmp.lt.s32.totalorder %s993_s0, %s989_s26 }
  0x1f   : > { %p992_p13 = pneg %p991_p12 }
  0x20   : > { %p996_p2 = por %p995_p1, %p994_p0 }
  0x22   : > { %p997_p3 = pnand %p996_p2, %p992_p13 }
  0x23   : > { %368 = vperm.xlu0 %971, %v354_v2  }
  0x8d   : > { %v359_v7 = vpop.permute.xlu0 %358 }
  0x8e   : > { %v363_v9 = vperm.slane %v359_v7, %v362_v8 }
  0x90   : > { %v365_v12 = vmul.f32 %v363_v9, %v355_v10 }
  0x95   : > { %v369_v11 = vpop.permute.xlu0 %368 }
  0x96   : > { %v373_v13 = vperm.slane %v369_v11, %v362_v8 }
  0x98   : > { %v375_v14 = vadd.f32 %v373_v13, %v365_v12 }
  0x9a   : > { %376 = vst [vmem:[%s351_s22] sm:$0xff] %v375_v14  ;;  %s732_s22 = sshll.u32 %s335_s14, 4  ;;  %s733_s22 = int_to_ptr.vmem [resolvable:$true] %s732_s22 }
  0x9b   : > { %378 = vst [vmem:[#allocation1] ss:$2 sm:$0xff] %v375_v14 }
  0xa2   : > { %v379_v15 = vld.sshfl [vmem:[#allocation1] sm:$0xff pattern:$0x75316420]  ;;  %v380_v16 = vld.sshfl [vmem:[#allocation1 + $0x8] sm:$0xff pattern:$0x75316420] }
  0xa3   : > { %v383_v17 = vpack.c.bf16 %v379_v15, %v379_v15  ;;  %v384_v18 = vpack.c.bf16 %v380_v16, %v380_v16 }
  0xa5   : > { %390 = vxpose.binary.xlu1.c.b16.start.end [1/2] (short) %v384_v18, %v383_v17, 128 }
 0x151   : > { %v398_v19 = vpop.trf.xlu1 }
 0x152   : > { %863 = vmatmul.msk.bf16.vlgmr.msra.gmra.mxu0 %vm414_vm1, %v398_v19 }
 0x159   : > { %v399_v20 = vpop.trf.xlu1 }
 0x161   : > { %v400_v21 = vpop.trf.xlu1 }
 0x162   : > { %864 = vmatmul.msk.bf16.gmra.mxu0 %vm414_vm1, %v400_v21 }
 0x169   : > { %v401_v22 = vpop.trf.xlu1 }
 0x171   : > { %v402_v23 = vpop.trf.xlu1 }
 0x172   : > { %865 = vmatmul.msk.bf16.gmra.mxu0 %vm414_vm1, %v402_v23 }
 0x179   : > { %v403_v24 = vpop.trf.xlu1 }
 0x17a   : > { %873 = vmatmul.msk.bf16.vlgmr.msra.gmra.mxu3 %vm414_vm1, %v403_v24 }
 0x181   : > { %v404_v25 = vpop.trf.xlu1 }
 0x182   : > { %866 = vmatmul.msk.bf16.gmra.mxu0 %vm414_vm1, %v404_v25 }
 0x189   : > { %v405_v26 = vpop.trf.xlu1 }
 0x18a   : > { %874 = vmatmul.msk.bf16.gmra.mxu3 %vm414_vm1, %v405_v26 }
 0x191   : > { %v406_v27 = vpop.trf.xlu1 }
 0x192   : > { %867 = vmatmul.msk.bf16.gmra.mxu0 %vm414_vm1, %v406_v27 }
 0x199   : > { %v407_v28 = vpop.trf.xlu1 }
 0x19a   : > { %875 = vmatmul.msk.bf16.gmra.mxu3 %vm414_vm1, %v407_v28 }
 0x1a1   : > { %v408_v29 = vpop.trf.xlu1 }
 0x1a2   : > { %868 = vmatmul.msk.bf16.vlgmr.msra.gmra.mxu2 %vm414_vm1, %v408_v29 }
 0x1a9   : > { %v409_v30 = vpop.trf.xlu1 }
 0x1aa   : > { %876 = vmatmul.msk.bf16.gmra.mxu3 %vm414_vm1, %v409_v30 }
 0x1b1   : > { %v410_v31 = vpop.trf.xlu1 }
 0x1b2   : > { %869 = vmatmul.msk.bf16.gmra.mxu2 %vm414_vm1, %v410_v31 }
 0x1b9   : > { %v411_v32 = vpop.trf.xlu1 }
 0x1ba   : > { %877 = vmatmul.msk.bf16.gmra.mxu3 %vm414_vm1, %v411_v32 }
 0x1c1   : > { %v412_v33 = vpop.trf.xlu1 }
 0x1c2   : > { %870 = vmatmul.msk.bf16.gmra.mxu2 %vm414_vm1, %v412_v33 }
 0x1c9   : > { %v413_v34 = vpop.trf.xlu1 }
 0x1ca   : > { %878 = vmatmul.msk.bf16.gmra.mxu3 %vm414_vm1, %v413_v34 }
 0x1cf   : > { %v476_v35 = vpop.f32.mrf.mxu0 }
 0x1d0   : > { %v477_v56 = vadd.f32 %v1215_v52, %v476_v35 }
 0x1d2   : > { %871 = vmatmul.msk.bf16.gmra.mxu2 %vm414_vm1, %v399_v20  ;;  %v556_v61 = vmax.f32 %v477_v56, 0.0 }
 0x1d7   : > { %v478_v36 = vpop.f32.mrf.mxu0 }
 0x1d8   : > { %v479_v54 = vadd.f32 %v1215_v52, %v478_v36 }
 0x1da   : > { %v557_v59 = vmax.f32 %v479_v54, 0.0 }
 0x1dc   : > { %v588_v1 = vadd.f32 %v557_v59, %v556_v61  ;;  %v920_v61 = vld [vmem:[%s1347_s5 + $0x28] sm:$0xff] }
 0x1df   : > { %v481_v37 = vpop.f32.mrf.mxu0 }
 0x1e0   : > { %v482_v57 = vadd.f32 %v1215_v52, %v481_v37 }
 0x1e2   : > { %872 = vmatmul.msk.bf16.gmra.mxu2 %vm414_vm1, %v401_v22  ;;  %v558_v62 = vmax.f32 %v482_v57, 0.0 }
 0x1e4   : > { %v589_v4 = vadd.f32 %v588_v1, %v558_v62 }
 0x1e7   : > { %v483_v39 = vpop.f32.mrf.mxu0 }
 0x1e8   : > { %v484_v60 = vadd.f32 %v1215_v52, %v483_v39 }
 0x1ea   : > { %v559_v2 = vmax.f32 %v484_v60, 0.0 }
 0x1ec   : > { %v590_v8 = vadd.f32 %v589_v4, %v559_v2 }
 0x1ef   : > { %v486_v41 = vpop.f32.mrf.mxu0 }
 0x1f0   : > { %v487_v63 = vadd.f32 %v1215_v52, %v486_v41  ;;  %v922_v41 = vld [vmem:[%s1347_s5 + $0x38] sm:$0xff] }
 0x1f1   : > { %695 = vmatpush.bf16.msra.mxu1 %v922_v41 }
 0x1f2   : > { %v560_v5 = vmax.f32 %v487_v63, 0.0 }
 0x1f4   : > { %v591_v12 = vadd.f32 %v590_v8, %v560_v5  ;;  %v919_v5 = vld [vmem:[%s1347_s5 + $0x20] sm:$0xff] }
 0x1f7   : > { %v488_v44 = vpop.f32.mrf.mxu0 }
 0x1f8   : > { %v489_v3 = vadd.f32 %v1215_v52, %v488_v44 }
 0x1fa   : > { %v561_v9 = vmax.f32 %v489_v3, 0.0 }
 0x1fc   : > { %v592_v16 = vadd.f32 %v591_v12, %v561_v9 }
 0x1fd   : > { %v1202_v38 = vpop.f32.mrf.mxu3 }
 0x1fe   : > { %v527_v1 = vadd.f32 %v1215_v52, %v1202_v38  ;;  %v918_v38 = vld [vmem:[%s1347_s5 + $0x18] sm:$0xff] }
 0x1ff   : > { %v491_v47 = vpop.f32.mrf.mxu0 }
 0x200   : > { %v492_v6 = vadd.f32 %v1215_v52, %v491_v47 }
 0x202   : > { %v562_v13 = vmax.f32 %v492_v6, 0.0 }
 0x204   : > { %v593_v19 = vadd.f32 %v592_v16, %v562_v13 }
 0x205   : > { %v1204_v40 = vpop.f32.mrf.mxu3 }
 0x206   : > { %v529_v6 = vadd.f32 %v1215_v52, %v1204_v40 }
 0x207   : > { %v493_v51 = vpop.f32.mrf.mxu0 }
 0x208   : > { %v494_v10 = vadd.f32 %v1215_v52, %v493_v51  ;;  %v577_v13 = vmax.f32 %v529_v6, 0.0 }
 0x20a   : > { %v563_v17 = vmax.f32 %v494_v10, 0.0  ;;  %v576_v10 = vmax.f32 %v527_v1, 0.0 }
 0x20c   : > { %v594_v22 = vadd.f32 %v593_v19, %v563_v17 }
 0x20d   : > { %v1206_v43 = vpop.f32.mrf.mxu3 }
 0x20f   : > { %v496_v58 = vpop.f32.mrf.mxu0 }
 0x210   : > { %v497_v14 = vadd.f32 %v1215_v52, %v496_v58 }
 0x212   : > { %v564_v20 = vmax.f32 %v497_v14, 0.0 }
 0x214   : > { %v595_v26 = vadd.f32 %v594_v22, %v564_v20 }
 0x215   : > { %v1208_v46 = vpop.f32.mrf.mxu3 }
 0x216   : > { %v534_v14 = vadd.f32 %v1215_v52, %v1208_v46 }
 0x217   : > { %v498_v11 = vpop.f32.mrf.mxu0 }
 0x218   : > { %v499_v18 = vadd.f32 %v1215_v52, %v498_v11  ;;  %v532_v11 = vadd.f32 %v1215_v52, %v1206_v43  ;;  %v917_v43 = vld [vmem:[%s1347_s5 + $0x10] sm:$0xff]  ;;  %v579_v19 = vmax.f32 %v534_v14, 0.0 }
 0x21a   : > { %v565_v23 = vmax.f32 %v499_v18, 0.0  ;;  %v578_v16 = vmax.f32 %v532_v11, 0.0 }
 0x21c   : > { %v596_v30 = vadd.f32 %v595_v26, %v565_v23 }
 0x21d   : > { %v1210_v49 = vpop.f32.mrf.mxu3 }
 0x21e   : > { %v537_v40 = vadd.f32 %v1215_v52, %v1210_v49  ;;  %v916_v49 = vld [vmem:[%s1347_s5 + $0x8] sm:$0xff] }
 0x220   : > { %v580_v22 = vmax.f32 %v537_v40, 0.0 }
 0x225   : > { %v501_v42 = vpop.f32.mrf.mxu2  ;;  %v1218_v55 = vpop.f32.mrf.mxu3 }
 0x226   : > { %v502_v21 = vadd.f32 %v1215_v52, %v501_v42  ;;  %v539_v20 = vadd.f32 %v1215_v52, %v1218_v55  ;;  %v915_v55 = vld [vmem:[%s1347_s5] sm:$0xff] }
 0x228   : > { %v566_v27 = vmax.f32 %v502_v21, 0.0 }
 0x22a   : > { %v597_v33 = vadd.f32 %v596_v30, %v566_v27 }
 0x22d   : > { %v503_v45 = vpop.f32.mrf.mxu2  ;;  %v1226_v7 = vpop.f32.mrf.mxu3 }
 0x22e   : > { %v504_v24 = vadd.f32 %v1215_v52, %v503_v45  ;;  %v542_v46 = vadd.f32 %v1215_v52, %v1226_v7 }
 0x230   : > { %v567_v31 = vmax.f32 %v504_v24, 0.0  ;;  %v581_v24 = vmax.f32 %v539_v20, 0.0 }
 0x232   : > { %v598_v36 = vadd.f32 %v597_v33, %v567_v31 }
 0x235   : > { %v506_v48 = vpop.f32.mrf.mxu2  ;;  %v1233_v25 = vpop.f32.mrf.mxu3 }
 0x236   : > { %v507_v28 = vadd.f32 %v1215_v52, %v506_v48  ;;  %v544_v26 = vadd.f32 %v1215_v52, %v1233_v25 }
 0x238   : > { %v568_v34 = vmax.f32 %v507_v28, 0.0  ;;  %v582_v28 = vmax.f32 %v542_v46, 0.0  ;;  %v583_v7 = vmax.f32 %v544_v26, 0.0 }
 0x23a   : > { %v599_v42 = vadd.f32 %v598_v36, %v568_v34 }
 0x23d   : > { %v508_v50 = vpop.f32.mrf.mxu2  ;;  %v546_v47 = vpop.f32.mrf.mxu3 }
 0x23e   : > { %v509_v32 = vadd.f32 %v1215_v52, %v508_v50 }
 0x240   : > { %v569_v37 = vmax.f32 %v509_v32, 0.0 }
 0x242   : > { %v600_v50 = vadd.f32 %v599_v42, %v569_v37 }
 0x245   : > { %v511_v53 = vpop.f32.mrf.mxu2  ;;  %v548_v4 = vpop.f32.mrf.mxu3 }
 0x246   : > { %v512_v35 = vadd.f32 %v1215_v52, %v511_v53  ;;  %v921_v53 = vld [vmem:[%s1347_s5 + $0x30] sm:$0xff]  ;;  %v549_v31 = vadd.f32 %v1215_v52, %v548_v4 }
 0x247   : > { %696 = vmatpush.bf16.msra.mxu1 %v921_v53 }
 0x248   : > { %v570_v44 = vmax.f32 %v512_v35, 0.0  ;;  %v585_v36 = vmax.f32 %v549_v31, 0.0 }
 0x24a   : > { %v601_v56 = vadd.f32 %v600_v50, %v570_v44 }
 0x24b   : > { %697 = vmatpush.bf16.msra.mxu1 %v920_v61 }
 0x24d   : > { %v513_v0 = vpop.f32.mrf.mxu2  ;;  %v551_v18 = vpop.f32.mrf.mxu3 }
 0x24e   : > { %v514_v39 = vadd.f32 %v1215_v52, %v513_v0  ;;  %v552_v35 = vadd.f32 %v1215_v52, %v551_v18 }
 0x24f   : > { %698 = vmatpush.bf16.msra.mxu1 %v919_v5 }
 0x250   : > { %v571_v51 = vmax.f32 %v514_v39, 0.0  ;;  %v586_v41 = vmax.f32 %v552_v35, 0.0 }
 0x252   : > { %v602_v59 = vadd.f32 %v601_v56, %v571_v51 }
 0x253   : > { %699 = vmatpush.bf16.msra.mxu1 %v918_v38 }
 0x255   : > { %v516_v15 = vpop.f32.mrf.mxu2  ;;  %v553_v33 = vpop.f32.mrf.mxu3 }
 0x256   : > { %v517_v45 = vadd.f32 %v1215_v52, %v516_v15  ;;  %v554_v39 = vadd.f32 %v1215_v52, %v553_v33 }
 0x257   : > { %700 = vmatpush.bf16.msra.mxu1 %v917_v43 }
 0x258   : > { %v572_v57 = vmax.f32 %v517_v45, 0.0  ;;  %v587_v45 = vmax.f32 %v554_v39, 0.0 }
 0x25a   : > { %v603_v62 = vadd.f32 %v602_v59, %v572_v57 }
 0x25b   : > { %701 = vmatpush.bf16.msra.mxu1 %v916_v49 }
 0x25d   : > { %v518_v29 = vpop.f32.mrf.mxu2 }
 0x25e   : > { %v519_v54 = vadd.f32 %v1215_v52, %v518_v29  ;;  %v547_v29 = vadd.f32 %v1215_v52, %v546_v47 }
 0x25f   : > { %702 = vmatpush.bf16.msra.mxu1 %v915_v55 }
 0x260   : > { %v573_v60 = vmax.f32 %v519_v54, 0.0  ;;  %v584_v34 = vmax.f32 %v547_v29, 0.0 }
 0x262   : > { %v604_v2 = vadd.f32 %v603_v62, %v573_v60 }
 0x265   : > { %v521_v48 = vpop.f32.mrf.mxu2 }
 0x266   : > { %v522_v58 = vadd.f32 %v1215_v52, %v521_v48 }
 0x268   : > { %v574_v63 = vmax.f32 %v522_v58, 0.0 }
 0x26a   : > { %v605_v8 = vadd.f32 %v604_v2, %v574_v63 }
 0x26d   : > { %v523_v0 = vpop.f32.mrf.mxu2 }
 0x26e   : > { %v524_v3 = vadd.f32 %v1215_v52, %v523_v0 }
 0x270   : > { %v575_v9 = vmax.f32 %v524_v3, 0.0 }
 0x272   : > { %v606_v12 = vadd.f32 %v605_v8, %v575_v9 }
 0x274   : > { %v607_v15 = vadd.f32 %v606_v12, %v576_v10 }
 0x276   : > { %v608_v17 = vadd.f32 %v607_v15, %v577_v13 }
 0x278   : > { %v609_v21 = vadd.f32 %v608_v17, %v578_v16 }
 0x27a   : > { %v610_v23 = vadd.f32 %v609_v21, %v579_v19 }
 0x27c   : > { %v611_v27 = vadd.f32 %v610_v23, %v580_v22 }
 0x27e   : > { %v612_v30 = vadd.f32 %v611_v27, %v581_v24 }
 0x280   : > { %v613_v32 = vadd.f32 %v612_v30, %v582_v28 }
 0x282   : > { %v614_v25 = vadd.f32 %v613_v32, %v583_v7 }
 0x284   : > { %v615_v37 = vadd.f32 %v614_v25, %v584_v34 }
 0x286   : > { %v616_v42 = vadd.f32 %v615_v37, %v585_v36 }
 0x288   : > { %v617_v44 = vadd.f32 %v616_v42, %v586_v41 }
 0x28a   : > { %v618_v47 = vadd.f32 %v617_v44, %v587_v45 }
 0x28c   : > { %v619_v48 = vrot.slane %v618_v47, 4 }
 0x28e   : > { %v620_v50 = vadd.f32 %v619_v48, %v618_v47 }
 0x290   : > { %v621_v51 = vrot.slane %v620_v50, 2 }
 0x292   : > { %v622_v54 = vadd.f32 %v621_v51, %v620_v50 }
 0x294   : > { %v623_v53 = vrot.slane %v622_v54, 1 }
 0x296   : > { %v624_v56 = vadd.f32 %v623_v53, %v622_v54 }
 0x298   : > { %v625_v57 = vmul.f32 0.00390625, %v624_v56 }
 0x29a   : > { %626 = vst [vmem:[#allocation2] sm:$0x1] %v625_v57 }
 0x2a1   : > { %v627_v52 = vld [vmem:[#allocation2] sm:$0x1] }
 0x2a2   : > { %v629_v58 = vpack.c.bf16 %v627_v52, %v627_v52  ;;  %628 = vst [vmem:[%s335_s14] sm:$0x1] %v627_v52 }
 0x2a4   : > { %703 = vmatmul.bf16.vlgmr.msra.gmra.mxu1 %v629_v58 }
 0x2a5   : > { %1000 = shalt.err (!%p997_p3)
}
 0x2a6   : > { %925 = dma.vmem_to_hbm [thread:$0]  (%p1159_p5), %s733_s22, 16, %s735_s23, %s715_s24   ;;  %v646_v59 = vld [vmem:[%s1348_s6] sm:$0x1] }
 0x2a7   : > { %s743_s17 = scalar_lea.hbm %s1351_s9, %s1142_s13  ;;  %s341_s1 = scalar_lea.vmem [#allocation5], %s1288_s29 }
 0x2a8   : > { %s745_s0 = sshll.u32 %s341_s1, 4  ;;  %s747_s2 = sshll.u32 %s743_s17, 4  ;;  %s746_s0 = int_to_ptr.vmem [resolvable:$true] %s745_s0  ;;  %s748_s2 = int_to_ptr.hbm [resolvable:$true] %s747_s2 }
 0x2a9   : > { %s719_s25 = scalar_lea.sflag [#allocation6], %s1288_s29  ;;  %s1015_s26 = sshra.s32 %s748_s2, 4  ;;  %s1016_s26 = int_to_ptr.hbm [resolvable:$true] %s1015_s26 }
 0x2aa   : > { %s1017_s22 = scalar_lea.hbm %s1016_s26, 1  ;;  %s1021_s24 = scalar_lea.hbm %s1351_s9, 2 }
 0x2ab   : > { %p1018_p4 = scmp.ne.s32.totalorder %s1016_s26, %s1017_s22  ;;  %p1022_p9 = scmp.lt.s32.totalorder %s1016_s26, %s1351_s9 }
 0x2ac   : > { %p1023_p10 = scmp.lt.s32.totalorder %s1021_s24, %s1017_s22 }
 0x2ad   : > { %p1019_p7 = pnand %p1018_p4, %p1159_p5 }
 0x2ae   : > { %p1024_p11 = por %p1023_p10, %p1022_p9 }
 0x2af   : > { %p1020_p8 = pneg %p1019_p7 }
 0x2b1   : > { %p1025_p12 = pnand %p1024_p11, %p1020_p8 }
 0x321   : > { %v704_v60 = vpop.f32.mrf.mxu1 }
 0x322   : > { %v705_v61 = vadd.f32 %v704_v60, %v646_v59 }
 0x324   : > { %708 = vst [vmem:[%s341_s1] sm:$0x1] %v705_v61 }
 0x325   : > { %1028 = shalt.err (!%p1025_p12)
}
 0x326   : > { %926 = dma.vmem_to_hbm [thread:$0]  (%p1159_p5), %s746_s0, 16, %s748_s2, %s719_s25  }
 0x329   : > { %v706_v62 = vpop.f32.mrf.mxu1 }
 0x32a PF: > { %p936_p13 = scmp.ge.s32.totalorder %s1067_s12, 2  ;;  %s767_s29 = sand.u32 1, %s1055_s30  }
 0x32b   : > { %s768_s16 = scalar_lea.sflag [#allocation4], %s767_s29 }
 0x32c   : > { %p930_p0 = pnand %p936_p13, %p1163_p6 }
 0x32e   : > { %p931_p1 = pneg %p930_p0 }
 0x330   : > { %1046 = dma.done.wait (%p931_p1), %s768_s16, 16  }
 0x331   : > { %1048 = vsyncadd (%p931_p1), %s768_s16, 4294967280  ;;  %s777_s17 = scalar_lea.sflag [#allocation6], %s767_s29 }
 0x332   : > { %1050 = dma.done.wait (%p931_p1), %s777_s17, 16  }
 0x333   : > { %1052 = vsyncadd (%p931_p1), %s777_s17, 4294967280  ;;  %p23_p5 = scmp.ge.s32.totalorder %s1146_s15, 4   ;;  %s1360_s30 = smov %s1059_s10 }
 0x334   : > { %s1361_s10 = smov %s1063_s11  ;;  %s1362_s11 = smov %s1157_s18 }
 0x335   : > { %s1363_s12 = smov %s1146_s15  ;;  %25 = sbr.rel (!%p23_p5) target bundleno = 9 (0x9), region = 112 }
 0x33a   :  { %782 = vsyncpa [#allocation4], 1 }
 0x33b   :  { %784 = vsyncpa [#allocation4 + $0x1], 1 }
 0x33c   :  { %785 = vsyncpa [#allocation6], 1 }
 0x33d   :  { %787 = vsyncpa [#allocation6 + $0x1], 1 }

</bundles_post_ra>
